<compile_context>
chip_gen: v5e
topology: v5e:2x2
jax: 0.10.0
libtpu: 0.0.40
codegen_flags: <defaults>
</compile_context>

<pallas_src>
import functools

import jax
import jax.numpy as jnp
import numpy as np
from jax import lax
from jax.experimental import pallas as pl
from jax.experimental.pallas import tpu as pltpu

LANE = 128


def _round_up(x, m):
    return ((x + m - 1) // m) * m


def _vmem_capacity_bytes():
    try:
        return int(pltpu.get_tpu_info().vmem_capacity_bytes)
    except Exception:
        return 64 * 1024 * 1024  # conservative fallback (v7x per-TC VMEM)


# --------------------------- fused conv kernel (stride == 1) ---------------------------
def _fused_conv_kernel(x_ref, w_ref, shift_ref, o_ref, acc_ref, *, K, TH, Wo, cin_p, cout_p):
    # x_ref:     (Hp_pad, Wp, cin_p)   full zero-padded NHWC image of current batch item (bf16)
    # w_ref:     (K*K, cin_p, cout_p)  conv weights with BN scale folded in (bf16)
    # shift_ref: (1, cout_p)           BN shift (f32)
    # o_ref:     (TH, Wo, cout_p)      output row tile (f32)
    # acc_ref:   (TH*Wo, cout_p)       f32 accumulator scratch
    r0 = pl.program_id(1) * TH
    acc_ref[...] = jnp.zeros_like(acc_ref)
    for kh in range(K):
        for kw in range(K):
            xs = x_ref[pl.ds(r0 + kh, TH), kw:kw + Wo, :]        # (TH, Wo, cin_p)
            acc_ref[...] += jnp.dot(xs.reshape(TH * Wo, cin_p),
                                    w_ref[kh * K + kw],
                                    preferred_element_type=jnp.float32)
    y = jnp.clip(acc_ref[...] + shift_ref[...], 0.0, 6.0)
    o_ref[...] = y.reshape(TH, Wo, cout_p).astype(o_ref.dtype)


def _fused_conv_bn_relu6(x_nhwc, w_oihw, scale, shift, *, K, padding):
    """stride == 1 path. Returns NHWC output (N, Ho, Wo, Cout) or None if it can't fit VMEM."""
    N, H, W, Cin = x_nhwc.shape
    Cout = w_oihw.shape[0]
    cin_p = _round_up(Cin, LANE)
    cout_p = _round_up(Cout, LANE)
    Ho = H + 2 * padding - K + 1
    Wo = W + 2 * padding - K + 1
    Wp = W + 2 * padding

    cap = _vmem_capacity_bytes()
    budget = int(cap * 0.45)
    w_bytes = K * K * cin_p * cout_p * 2

    # Output-row tile: target ~512 GEMM rows per grid step; keep >= 2 grid steps (v7x megacore).
    TH = max(1, min(Ho, max(8, 512 // max(Wo, 1))))
    if N == 1 and TH >= Ho and Ho > 1:
        TH = (Ho + 1) // 2

    def _need(th):
        ho_pad = _round_up(Ho, th)
        hp_pad = ho_pad + K - 1
        return (2 * hp_pad * Wp * cin_p * 2      # double-buffered input image (bf16)
                + 2 * w_bytes                    # double-buffered weights (bf16)
                + 2 * th * Wo * cout_p * 4       # double-buffered output tile (f32)
                + th * Wo * cout_p * 4           # f32 accumulator scratch
                + 2 * th * Wo * cin_p * 2)       # tap-slice temporaries

    while TH > 1 and _need(TH) > budget:
        TH = max(1, TH // 2)
    if _need(TH) > budget:
        return None  # image/weights too big for resident-image strategy -> GEMM fallback

    ho_pad = _round_up(Ho, TH)
    hp_pad = ho_pad + K - 1
    pad_bottom = padding + (ho_pad - Ho)

    xp = jnp.pad(x_nhwc, ((0, 0), (padding, pad_bottom), (padding, padding),
                          (0, cin_p - Cin))).astype(jnp.bfloat16)         # (N, hp_pad, Wp, cin_p)

    w = jnp.transpose(w_oihw, (2, 3, 1, 0)) * scale[None, None, None, :]  # (K, K, Cin, Cout)
    w = jnp.pad(w, ((0, 0), (0, 0), (0, cin_p - Cin), (0, cout_p - Cout)))
    w = w.reshape(K * K, cin_p, cout_p).astype(jnp.bfloat16)
    shift_p = jnp.pad(shift, (0, cout_p - Cout)).reshape(1, cout_p).astype(jnp.float32)

    kernel = functools.partial(_fused_conv_kernel, K=K, TH=TH, Wo=Wo,
                               cin_p=cin_p, cout_p=cout_p)
    flops = 2 * N * ho_pad * Wo * K * K * cin_p * cout_p
    bytes_accessed = xp.size * 2 + w.size * 2 + shift_p.size * 4 + N * ho_pad * Wo * cout_p * 4

    out = pl.pallas_call(
        kernel,
        out_shape=jax.ShapeDtypeStruct((N, ho_pad, Wo, cout_p), jnp.float32),
        grid_spec=pltpu.PrefetchScalarGridSpec(
            num_scalar_prefetch=0,
            grid=(N, ho_pad // TH),
            in_specs=[
                pl.BlockSpec((None, hp_pad, Wp, cin_p), lambda n, h: (n, 0, 0, 0)),
                pl.BlockSpec((K * K, cin_p, cout_p), lambda n, h: (0, 0, 0)),
                pl.BlockSpec((1, cout_p), lambda n, h: (0, 0)),
            ],
            out_specs=pl.BlockSpec((None, TH, Wo, cout_p), lambda n, h: (n, h, 0, 0)),
            scratch_shapes=[pltpu.VMEM((TH * Wo, cout_p), jnp.float32)],
        ),
        compiler_params=pltpu.CompilerParams(
            dimension_semantics=("parallel", "parallel"),
            vmem_limit_bytes=min(int(cap * 0.85), 112 << 20),
        ),
        cost_estimate=pl.CostEstimate(flops=int(flops), transcendentals=0,
                                      bytes_accessed=int(bytes_accessed)),
    )(xp, w, shift_p)
    return out[:, :Ho, :, :Cout]


# ---------------------- GEMM fallback (stride != 1 or VMEM overflow) --------------------
def _gemm_bn_relu6_kernel(p_ref, w_ref, shift_ref, o_ref):
    acc = jnp.dot(p_ref[...], w_ref[...], preferred_element_type=jnp.float32)
    o_ref[...] = jnp.clip(acc + shift_ref[...], 0.0, 6.0).astype(o_ref.dtype)


def _im2col_gemm(x_nhwc, w_oihw, scale, shift, *, K, stride, padding):
    # TODO(synk): for very large K*K*Cin add a reduction grid axis over the contraction dim
    # (accumulator + pl.when init/finalize) instead of keeping the whole weight resident.
    N, H, W, Cin = x_nhwc.shape
    Cout = w_oihw.shape[0]
    cin_p = _round_up(Cin, LANE)
    cout_p = _round_up(Cout, LANE)
    Ho = (H + 2 * padding - K) // stride + 1
    Wo = (W + 2 * padding - K) // stride + 1
    Kf = K * K * cin_p

    xp = jnp.pad(x_nhwc, ((0, 0), (padding, padding), (padding, padding),
                          (0, cin_p - Cin))).astype(jnp.bfloat16)
    cols = []
    for kh in range(K):
        for kw in range(K):
            cols.append(xp[:, kh:kh + stride * (Ho - 1) + 1:stride,
                           kw:kw + stride * (Wo - 1) + 1:stride, :])
    patches = jnp.concatenate(cols, axis=-1).reshape(N * Ho * Wo, Kf)

    M = N * Ho * Wo
    tm = 256
    m_pad = _round_up(M, tm)
    if m_pad // tm < 2 and M > 16:          # keep >= 2 grid steps for v7x's 2 TensorCores
        tm = max(16, _round_up((M + 1) // 2, 16))
        m_pad = _round_up(M, tm)
    patches = jnp.pad(patches, ((0, m_pad - M), (0, 0)))

    w = jnp.transpose(w_oihw, (2, 3, 1, 0)) * scale[None, None, None, :]
    w = jnp.pad(w, ((0, 0), (0, 0), (0, cin_p - Cin), (0, cout_p - Cout)))
    w = w.reshape(Kf, cout_p).astype(jnp.bfloat16)
    shift_p = jnp.pad(shift, (0, cout_p - Cout)).reshape(1, cout_p).astype(jnp.float32)

    cap = _vmem_capacity_bytes()
    flops = 2 * m_pad * Kf * cout_p
    bytes_accessed = patches.size * 2 + w.size * 2 + shift_p.size * 4 + m_pad * cout_p * 4

    out = pl.pallas_call(
        _gemm_bn_relu6_kernel,
        out_shape=jax.ShapeDtypeStruct((m_pad, cout_p), jnp.float32),
        grid_spec=pltpu.PrefetchScalarGridSpec(
            num_scalar_prefetch=0,
            grid=(m_pad // tm,),
            in_specs=[
                pl.BlockSpec((tm, Kf), lambda i: (i, 0)),
                pl.BlockSpec((Kf, cout_p), lambda i: (0, 0)),
                pl.BlockSpec((1, cout_p), lambda i: (0, 0)),
            ],
            out_specs=pl.BlockSpec((tm, cout_p), lambda i: (i, 0)),
        ),
        compiler_params=pltpu.CompilerParams(
            dimension_semantics=("parallel",),
            vmem_limit_bytes=min(int(cap * 0.85), 112 << 20),
        ),
        cost_estimate=pl.CostEstimate(flops=int(flops), transcendentals=0,
                                      bytes_accessed=int(bytes_accessed)),
    )(patches, w, shift_p)
    return out[:M, :Cout].reshape(N, Ho, Wo, Cout)


# ------------------------------------- wrappers -----------------------------------------
def basic_conv2d_forward_nhwc(x_nhwc, params, *, kernel_size, stride, padding, eps=1e-5):
    """NHWC entry point (preferred: avoids layout transposes on the hot path)."""
    # TODO(synk): groups != 1 not implemented (module default groups=1).
    w_oihw = params["conv_weight"]
    scale = params["bn_weight"] / jnp.sqrt(params["bn_running_var"] + eps)
    shift = params["bn_bias"] - params["bn_running_mean"] * scale

    if stride == 1:
        out = _fused_conv_bn_relu6(x_nhwc, w_oihw, scale, shift,
                                   K=kernel_size, padding=padding)
        if out is not None:
            return out
    # TODO(synk): stride != 1 is not fused; it falls back to a materialized-im2col GEMM.
    return _im2col_gemm(x_nhwc, w_oihw, scale, shift,
                        K=kernel_size, stride=stride, padding=padding)


def basic_conv2d_forward(x_nchw, params, *, kernel_size, stride, padding, eps=1e-5):
    """NCHW wrapper matching the PyTorch module interface."""
    x_nhwc = jnp.transpose(x_nchw, (0, 2, 3, 1))
    out_nhwc = basic_conv2d_forward_nhwc(x_nhwc, params, kernel_size=kernel_size,
                                         stride=stride, padding=padding, eps=eps)
    return jnp.transpose(out_nhwc, (0, 3, 1, 2))


def init_params(key, in_planes, out_planes, kernel_size):
    k_w, k_g, k_b, k_m, k_v = jax.random.split(key, 5)
    fan_in = in_planes * kernel_size * kernel_size
    bound = 1.0 / np.sqrt(fan_in)
    return {
        "conv_weight": jax.random.uniform(
            k_w, (out_planes, in_planes, kernel_size, kernel_size),
            minval=-bound, maxval=bound, dtype=jnp.float32),
        "bn_weight": jax.random.uniform(k_g, (out_planes,), minval=0.5, maxval=1.5,
                                        dtype=jnp.float32),
        "bn_bias": jax.random.uniform(k_b, (out_planes,), minval=-0.5, maxval=0.5,
                                      dtype=jnp.float32),
        "bn_running_mean": jax.random.normal(k_m, (out_planes,), dtype=jnp.float32) * 0.1,
        "bn_running_var": jax.random.uniform(k_v, (out_planes,), minval=0.5, maxval=1.5,
                                             dtype=jnp.float32),
    }


# -------------------------------- reference (XLA conv) ----------------------------------
def _reference(x_nchw, params, *, kernel_size, stride, padding, eps=1e-5):
    """Mirrors the kernel's numerics: bf16-rounded inputs/scaled-weights, f32 accumulation."""
    scale = params["bn_weight"] / jnp.sqrt(params["bn_running_var"] + eps)
    shift = params["bn_bias"] - params["bn_running_mean"] * scale
    w = params["conv_weight"] * scale[:, None, None, None]
    xb = x_nchw.astype(jnp.bfloat16).astype(jnp.float32)
    wb = w.astype(jnp.bfloat16).astype(jnp.float32)
    y = lax.conv_general_dilated(
        xb, wb, window_strides=(stride, stride),
        padding=((padding, padding), (padding, padding)),
        dimension_numbers=("NCHW", "OIHW", "NCHW"))
    y = y + shift[None, :, None, None]
    return jnp.clip(y, 0.0, 6.0)


if __name__ == "__main__":
    key = jax.random.PRNGKey(0)
    k_x, k_p1, k_p2 = jax.random.split(key, 3)

    N, Cin, H, W = 2, 4, 16, 16
    Cout = 8
    x = jax.random.normal(k_x, (N, Cin, H, W), dtype=jnp.float32)

    ok = True

    # Config 1: module defaults (1x1 conv, stride 1, pad 0)
    p1 = init_params(k_p1, Cin, Cout, 1)
    fwd1 = jax.jit(functools.partial(basic_conv2d_forward,
                                     kernel_size=1, stride=1, padding=0))
    out1 = jax.block_until_ready(fwd1(x, p1))
    ref1 = _reference(x, p1, kernel_size=1, stride=1, padding=0)
    ok &= bool(np.allclose(np.asarray(out1), np.asarray(ref1), atol=5e-3, rtol=5e-3))

    # Config 2: 3x3 conv, stride 1, padding 1
    p2 = init_params(k_p2, Cin, Cout, 3)
    fwd2 = jax.jit(functools.partial(basic_conv2d_forward,
                                     kernel_size=3, stride=1, padding=1))
    out2 = jax.block_until_ready(fwd2(x, p2))
    ref2 = _reference(x, p2, kernel_size=3, stride=1, padding=1)
    ok &= bool(np.allclose(np.asarray(out2), np.asarray(ref2), atol=5e-3, rtol=5e-3))

    ok &= out1.shape == (N, Cout, H, W) and out2.shape == (N, Cout, H, W)
    if ok:
        print("KERNEL_OK")
    else:
        print("KERNEL_MISMATCH")
</pallas_src>

<mosaic_0001>
module attributes {stable_mosaic.version = 11 : i64} {
  func.func @_fused_conv_kernel(%arg0: i32, %arg1: i32, %arg2: memref<1x16x16x128xbf16, #tpu.memory_space<vmem>>, %arg3: memref<1x128x128xbf16, #tpu.memory_space<vmem>>, %arg4: memref<1x128xf32, #tpu.memory_space<vmem>>, %arg5: memref<1x16x16x128xf32, #tpu.memory_space<vmem>>, %arg6: memref<256x128xf32, #tpu.memory_space<vmem>>) attributes {dimension_semantics = [#tpu.dimension_semantics<parallel>, #tpu.dimension_semantics<parallel>], iteration_bounds = array<i64: 2, 1>, scalar_prefetch = 0 : i64, scratch_operands = 1 : i64, tpu.core_type = #tpu.core_type<tc>, window_params = [{transform_indices = @transform_0, window_bounds = array<i64: 1, 16, 16, 128>}, {pipeline_mode = #tpu.pipeline_mode<synchronous>, transform_indices = @transform_1, window_bounds = array<i64: 1, 128, 128>}, {pipeline_mode = #tpu.pipeline_mode<synchronous>, transform_indices = @transform_2, window_bounds = array<i64: 1, 128>}, {transform_indices = @transform_3, window_bounds = array<i64: 1, 16, 16, 128>}]} {
    %c16_i32 = arith.constant 16 : i32
    %0 = arith.muli %arg1, %c16_i32 : i32
    %cst = arith.constant 0.000000e+00 : f32
    %1 = vector.broadcast %cst : f32 to vector<256x128xf32>
    %c0 = arith.constant 0 : index
    %c0_0 = arith.constant 0 : index
    %2 = vector.load %arg6[%c0, %c0_0] : memref<256x128xf32, #tpu.memory_space<vmem>>, vector<256x128xf32>
    tpu.vector_store %arg6[%c0, %c0_0], %1 {strides = array<i32>} : memref<256x128xf32, #tpu.memory_space<vmem>>, vector<256x128xf32>,
    %c0_i32 = arith.constant 0 : i32
    %3 = arith.addi %0, %c0_i32 : i32
    %c0_1 = arith.constant 0 : index
    %4 = arith.index_cast %3 : i32 to index
    %c0_2 = arith.constant 0 : index
    %c0_3 = arith.constant 0 : index
    %5 = vector.load %arg2[%c0_1, %4, %c0_2, %c0_3] : memref<1x16x16x128xbf16, #tpu.memory_space<vmem>>, vector<1x16x16x128xbf16>
    %6 = vector.shape_cast %5 : vector<1x16x16x128xbf16> to vector<16x16x128xbf16>
    %c0_4 = arith.constant 0 : index
    %c0_5 = arith.constant 0 : index
    %7 = vector.load %arg6[%c0_4, %c0_5] : memref<256x128xf32, #tpu.memory_space<vmem>>, vector<256x128xf32>
    %8 = vector.shape_cast %6 : vector<16x16x128xbf16> to vector<256x128xbf16>
    %c0_6 = arith.constant 0 : index
    %c0_7 = arith.constant 0 : index
    %c0_8 = arith.constant 0 : index
    %9 = vector.load %arg3[%c0_6, %c0_7, %c0_8] : memref<1x128x128xbf16, #tpu.memory_space<vmem>>, vector<1x128x128xbf16>
    %10 = vector.shape_cast %9 : vector<1x128x128xbf16> to vector<128x128xbf16>
    %cst_9 = arith.constant dense<0.000000e+00> : vector<256x128xf32>
    %11 = tpu.matmul %8, %10, %cst_9 {dimension_numbers = #tpu.dot_dimension_numbers<[1], [0], [0], [1], [0, 0, 1, 1], [], []>} : vector<256x128xbf16>, vector<128x128xbf16>, vector<256x128xf32> -> vector<256x128xf32>
    %12 = arith.addf %7, %11 : vector<256x128xf32>
    %c0_10 = arith.constant 0 : index
    %c0_11 = arith.constant 0 : index
    %13 = vector.load %arg6[%c0_10, %c0_11] : memref<256x128xf32, #tpu.memory_space<vmem>>, vector<256x128xf32>
    tpu.vector_store %arg6[%c0_10, %c0_11], %12 {strides = array<i32>} : memref<256x128xf32, #tpu.memory_space<vmem>>, vector<256x128xf32>,
    %c0_12 = arith.constant 0 : index
    %c0_13 = arith.constant 0 : index
    %14 = vector.load %arg6[%c0_12, %c0_13] : memref<256x128xf32, #tpu.memory_space<vmem>>, vector<256x128xf32>
    %c0_14 = arith.constant 0 : index
    %c0_15 = arith.constant 0 : index
    %15 = vector.load %arg4[%c0_14, %c0_15] : memref<1x128xf32, #tpu.memory_space<vmem>>, vector<1x128xf32>
    %16 = vector.broadcast %15 : vector<1x128xf32> to vector<256x128xf32>
    %17 = arith.addf %14, %16 : vector<256x128xf32>
    %cst_16 = arith.constant 0.000000e+00 : f32
    %cst_17 = arith.constant 6.000000e+00 : f32
    %18 = vector.broadcast %cst_16 : f32 to vector<256x128xf32>
    %19 = arith.maximumf %18, %17 : vector<256x128xf32>
    %20 = vector.broadcast %cst_17 : f32 to vector<256x128xf32>
    %21 = arith.minimumf %20, %19 : vector<256x128xf32>
    %22 = vector.shape_cast %21 : vector<256x128xf32> to vector<16x16x128xf32>
    %c0_18 = arith.constant 0 : index
    %c0_19 = arith.constant 0 : index
    %c0_20 = arith.constant 0 : index
    %c0_21 = arith.constant 0 : index
    %23 = vector.load %arg5[%c0_18, %c0_19, %c0_20, %c0_21] : memref<1x16x16x128xf32, #tpu.memory_space<vmem>>, vector<1x16x16x128xf32>
    %24 = vector.shape_cast %23 : vector<1x16x16x128xf32> to vector<16x16x128xf32>
    %25 = vector.shape_cast %22 : vector<16x16x128xf32> to vector<1x16x16x128xf32>
    tpu.vector_store %arg5[%c0_18, %c0_19, %c0_20, %c0_21], %25 {strides = array<i32>} : memref<1x16x16x128xf32, #tpu.memory_space<vmem>>, vector<1x16x16x128xf32>,
    return
  }
  func.func @transform_0(%arg0: i32, %arg1: i32) -> (i32, i32, i32, i32) {
    %c0_i32 = arith.constant 0 : i32
    %c0_i32_0 = arith.constant 0 : i32
    %c0_i32_1 = arith.constant 0 : i32
    %c0_i32_2 = arith.constant 0 : i32
    return %arg0, %c0_i32, %c0_i32_0, %c0_i32_1 : i32, i32, i32, i32
  }
  func.func @transform_1(%arg0: i32, %arg1: i32) -> (i32, i32, i32) {
    %c0_i32 = arith.constant 0 : i32
    %c0_i32_0 = arith.constant 0 : i32
    %c0_i32_1 = arith.constant 0 : i32
    %c0_i32_2 = arith.constant 0 : i32
    return %c0_i32, %c0_i32_0, %c0_i32_1 : i32, i32, i32
  }
  func.func @transform_2(%arg0: i32, %arg1: i32) -> (i32, i32) {
    %c0_i32 = arith.constant 0 : i32
    %c0_i32_0 = arith.constant 0 : i32
    %c0_i32_1 = arith.constant 0 : i32
    return %c0_i32, %c0_i32_0 : i32, i32
  }
  func.func @transform_3(%arg0: i32, %arg1: i32) -> (i32, i32, i32, i32) {
    %c0_i32 = arith.constant 0 : i32
    %c0_i32_0 = arith.constant 0 : i32
    %c0_i32_1 = arith.constant 0 : i32
    return %arg0, %arg1, %c0_i32, %c0_i32_0 : i32, i32, i32, i32
  }
}

</mosaic_0001>

<bundles_post_ra>
// kernel: basic_conv2d_forward.1
= control target key start
LH: loop header
LB: loop body
LE: loop exit
PB: predicated region body
PF: predicated region fallthrough
CT: control target
= control target key end

     0   :  { %s1088_s12 = smov 0   ;;  %s1090_s13 = smov 0   ;;  %s1242_s0 = inlined_call_operand.vmem [shape: bf16[2,16,16,128], index: 0, kind: input, shape index: {}]   ;;  %s1243_s1 = inlined_call_operand.vmem [shape: bf16[1,128,128], index: 1, kind: input, shape index: {}]   ;;  %s1244_s2 = inlined_call_operand.vmem [shape: f32[1,128], index: 2, kind: input, shape index: {}]   ;;  %s1245_s3 = inlined_call_operand.vmem [shape: f32[2,16,16,128], index: 3, kind: output, shape index: {}]  }
   0x1   :  { %s1092_s14 = smov 0  }
   0x2 LB: > { %s25_s15 = sadd.s32 1, %s1062_s13  ;;  %p866_p0 = scmp.ge.s32.totalorder %s1066_s14, 1  ;;  %s1066_s14 = sphi %s1092_s14, %s13_s14   ;;  %s1062_s13 = sphi %s1090_s13, %s1247_s13   ;;  %s1058_s12 = sphi %s1088_s12, %s1246_s12  }
   0x3   : > { %p27_p1 = scmp.ge.s32.totalorder %s25_s15, 2  ;;  %p151_p2 = scmp.lt.s32.totalorder %s1066_s14, 3 }
   0x5   : > { %s1249_s15 = smov (%p27_p1, %s25_s15), 0  ;;  %p152_p3 = pnand %p866_p0, %p151_p2 }
   0x6   : > { %p180_p4 = scmp.lt.s32.totalorder (!%p152_p3), %s1058_s12, 1 }
   0x7   : > { %155 = sbr.rel (%p152_p3) target bundleno = 241 (0xf1), region = 32 }
   0xc   : > { %v994_v0 = vld [vmem:[%s1243_s1 + $0x38] sm:$0xff]  ;;  %v993_v1 = vld [vmem:[%s1243_s1 + $0x30] sm:$0xff]  ;;  %v992_v2 = vld [vmem:[%s1243_s1 + $0x28] sm:$0xff]  ;;  %s1251_s12 = smov (!%p180_p4, %s1058_s12), 1 }
   0xd   : > { %456 = vmatpush.bf16.msra.mxu0 %v994_v0  ;;  %995 = vmatpush.bf16.msra.mxu1 %v994_v0  ;;  %v991_v3 = vld [vmem:[%s1243_s1 + $0x20] sm:$0xff]  ;;  %v990_v4 = vld [vmem:[%s1243_s1 + $0x18] sm:$0xff]  ;;  %v989_v5 = vld [vmem:[%s1243_s1 + $0x10] sm:$0xff]  ;;  %s969_s30 = sshll.u32 %s1251_s12, 7  ;;  %s970_s11 = sshll.u32 %s1251_s12, 8 }
   0xe   : > { %996 = vmatpush.bf16.msra.mxu2 %v994_v0  ;;  %997 = vmatpush.bf16.msra.mxu3 %v994_v0  ;;  %v988_v6 = vld [vmem:[%s1243_s1 + $0x8] sm:$0xff]  ;;  %v987_v7 = vld [vmem:[%s1243_s1] sm:$0xff]  ;;  %s1140_s8 = scalar_lea.vmem %s1242_s0, %s969_s30  ;;  %s1169_s18 = scalar_lea.vmem %s1245_s3, %s970_s11 }
   0xf   : > { %v971_v8 = vld [vmem:[%s1140_s8] sm:$0xff]  ;;  %v972_v12 = vld [vmem:[%s1140_s8 + $0x8] sm:$0xff]  ;;  %v973_v16 = vld [vmem:[%s1140_s8 + $0x10] sm:$0xff] }
  0x10   : > { %v975_v9 = vld [vmem:[%s1140_s8 + $0x20] sm:$0xff]  ;;  %v976_v13 = vld [vmem:[%s1140_s8 + $0x28] sm:$0xff]  ;;  %v977_v17 = vld [vmem:[%s1140_s8 + $0x30] sm:$0xff] }
  0x11   : > { %457 = vmatpush.bf16.msra.mxu0 %v993_v1  ;;  %998 = vmatpush.bf16.msra.mxu1 %v993_v1  ;;  %v979_v10 = vld [vmem:[%s1140_s8 + $0x40] sm:$0xff]  ;;  %v980_v14 = vld [vmem:[%s1140_s8 + $0x48] sm:$0xff]  ;;  %v981_v18 = vld [vmem:[%s1140_s8 + $0x50] sm:$0xff] }
  0x12   : > { %999 = vmatpush.bf16.msra.mxu2 %v993_v1  ;;  %1000 = vmatpush.bf16.msra.mxu3 %v993_v1  ;;  %v983_v11 = vld [vmem:[%s1140_s8 + $0x60] sm:$0xff]  ;;  %v984_v15 = vld [vmem:[%s1140_s8 + $0x68] sm:$0xff]  ;;  %v985_v19 = vld [vmem:[%s1140_s8 + $0x70] sm:$0xff] }
  0x13   : > { %v974_v20 = vld [vmem:[%s1140_s8 + $0x18] sm:$0xff]  ;;  %v1161_v24 = vld [vmem:[%s1244_s2] ss:$0 sm:$0xff] }
  0x14   : > { %v978_v21 = vld [vmem:[%s1140_s8 + $0x38] sm:$0xff] }
  0x15   : > { %458 = vmatpush.bf16.msra.mxu0 %v992_v2  ;;  %1001 = vmatpush.bf16.msra.mxu1 %v992_v2  ;;  %v982_v22 = vld [vmem:[%s1140_s8 + $0x58] sm:$0xff] }
  0x16   : > { %1002 = vmatpush.bf16.msra.mxu2 %v992_v2  ;;  %1003 = vmatpush.bf16.msra.mxu3 %v992_v2  ;;  %v986_v23 = vld [vmem:[%s1140_s8 + $0x78] sm:$0xff] }
  0x19   : > { %459 = vmatpush.bf16.msra.mxu0 %v991_v3  ;;  %1004 = vmatpush.bf16.msra.mxu1 %v991_v3 }
  0x1a   : > { %1005 = vmatpush.bf16.msra.mxu2 %v991_v3  ;;  %1006 = vmatpush.bf16.msra.mxu3 %v991_v3 }
  0x1d   : > { %460 = vmatpush.bf16.msra.mxu0 %v990_v4  ;;  %1007 = vmatpush.bf16.msra.mxu1 %v990_v4 }
  0x1e   : > { %1008 = vmatpush.bf16.msra.mxu2 %v990_v4  ;;  %1009 = vmatpush.bf16.msra.mxu3 %v990_v4 }
  0x21   : > { %461 = vmatpush.bf16.msra.mxu0 %v989_v5  ;;  %1010 = vmatpush.bf16.msra.mxu1 %v989_v5 }
  0x22   : > { %1011 = vmatpush.bf16.msra.mxu2 %v989_v5  ;;  %1012 = vmatpush.bf16.msra.mxu3 %v989_v5 }
  0x25   : > { %462 = vmatpush.bf16.msra.mxu0 %v988_v6  ;;  %1013 = vmatpush.bf16.msra.mxu1 %v988_v6 }
  0x26   : > { %1014 = vmatpush.bf16.msra.mxu2 %v988_v6  ;;  %1015 = vmatpush.bf16.msra.mxu3 %v988_v6 }
  0x29   : > { %463 = vmatpush.bf16.msra.mxu0 %v987_v7  ;;  %1016 = vmatpush.bf16.msra.mxu1 %v987_v7 }
  0x2a   : > { %1017 = vmatpush.bf16.msra.mxu2 %v987_v7  ;;  %1018 = vmatpush.bf16.msra.mxu3 %v987_v7 }
  0x2c   : > { %464 = vmatmul.bf16.vlgmr.msra.gmra.mxu0 %v971_v8  ;;  %484 = vmatmul.bf16.vlgmr.msra.gmra.mxu1 %v975_v9 }
  0x2d   : > { %504 = vmatmul.bf16.vlgmr.msra.gmra.mxu2 %v979_v10  ;;  %524 = vmatmul.bf16.vlgmr.msra.gmra.mxu3 %v983_v11 }
  0x3c   : > { %469 = vmatmul.bf16.gmra.mxu0 %v972_v12  ;;  %489 = vmatmul.bf16.gmra.mxu1 %v976_v13 }
  0x3d   : > { %509 = vmatmul.bf16.gmra.mxu2 %v980_v14  ;;  %529 = vmatmul.bf16.gmra.mxu3 %v984_v15 }
  0x4c   : > { %474 = vmatmul.bf16.gmra.mxu0 %v973_v16  ;;  %494 = vmatmul.bf16.gmra.mxu1 %v977_v17 }
  0x4d   : > { %514 = vmatmul.bf16.gmra.mxu2 %v981_v18  ;;  %534 = vmatmul.bf16.gmra.mxu3 %v985_v19 }
  0x5c   : > { %479 = vmatmul.bf16.gmra.mxu0 %v974_v20  ;;  %499 = vmatmul.bf16.gmra.mxu1 %v978_v21 }
  0x5d   : > { %519 = vmatmul.bf16.gmra.mxu2 %v982_v22  ;;  %539 = vmatmul.bf16.gmra.mxu3 %v986_v23 }
  0xa9   : > { %v465_v25 = vpop.f32.mrf.mxu0  ;;  %v485_v26 = vpop.f32.mrf.mxu1 }
  0xaa   : > { %v645_v27 = vadd.f32 %v1161_v24, %v465_v25  ;;  %v653_v28 = vadd.f32 %v1161_v24, %v485_v26 }
  0xac   : > { %v677_v29 = vmax.f32 %v645_v27, 0.0  ;;  %v685_v30 = vmax.f32 %v653_v28, 0.0 }
  0xae   : > { %v709_v31 = vmin.f32 %v677_v29, 6.0  ;;  %v717_v32 = vmin.f32 %v685_v30, 6.0 }
  0xb0   : > { %741 = vst [vmem:[%s1169_s18] sm:$0xff] %v709_v31  ;;  %v505_v33 = vpop.f32.mrf.mxu2  ;;  %v525_v34 = vpop.f32.mrf.mxu3 }
  0xb1   : > { %749 = vst [vmem:[%s1169_s18 + $0x40] sm:$0xff] %v717_v32  ;;  %v661_v35 = vadd.f32 %v1161_v24, %v505_v33  ;;  %v669_v36 = vadd.f32 %v1161_v24, %v525_v34  ;;  %v467_v37 = vpop.f32.mrf.mxu0  ;;  %v487_v38 = vpop.f32.mrf.mxu1 }
  0xb2   : > { %v646_v39 = vadd.f32 %v1161_v24, %v467_v37  ;;  %v654_v40 = vadd.f32 %v1161_v24, %v487_v38 }
  0xb3   : > { %v693_v41 = vmax.f32 %v661_v35, 0.0  ;;  %v701_v42 = vmax.f32 %v669_v36, 0.0 }
  0xb4   : > { %v678_v43 = vmax.f32 %v646_v39, 0.0  ;;  %v686_v44 = vmax.f32 %v654_v40, 0.0 }
  0xb5   : > { %v725_v45 = vmin.f32 %v693_v41, 6.0  ;;  %v733_v46 = vmin.f32 %v701_v42, 6.0 }
  0xb6   : > { %v710_v47 = vmin.f32 %v678_v43, 6.0  ;;  %v718_v48 = vmin.f32 %v686_v44, 6.0 }
  0xb7   : > { %757 = vst [vmem:[%s1169_s18 + $0x80] sm:$0xff] %v725_v45 }
  0xb8   : > { %765 = vst [vmem:[%s1169_s18 + $0xc0] sm:$0xff] %v733_v46  ;;  %v507_v49 = vpop.f32.mrf.mxu2  ;;  %v527_v50 = vpop.f32.mrf.mxu3 }
  0xb9   : > { %742 = vst [vmem:[%s1169_s18 + $0x8] sm:$0xff] %v710_v47  ;;  %v662_v51 = vadd.f32 %v1161_v24, %v507_v49  ;;  %v670_v52 = vadd.f32 %v1161_v24, %v527_v50  ;;  %v470_v53 = vpop.f32.mrf.mxu0  ;;  %v490_v54 = vpop.f32.mrf.mxu1 }
  0xba   : > { %750 = vst [vmem:[%s1169_s18 + $0x48] sm:$0xff] %v718_v48  ;;  %v647_v55 = vadd.f32 %v1161_v24, %v470_v53  ;;  %v655_v56 = vadd.f32 %v1161_v24, %v490_v54 }
  0xbb   : > { %v694_v57 = vmax.f32 %v662_v51, 0.0  ;;  %v702_v58 = vmax.f32 %v670_v52, 0.0 }
  0xbc   : > { %v679_v59 = vmax.f32 %v647_v55, 0.0  ;;  %v687_v60 = vmax.f32 %v655_v56, 0.0 }
  0xbd   : > { %v726_v61 = vmin.f32 %v694_v57, 6.0  ;;  %v734_v62 = vmin.f32 %v702_v58, 6.0 }
  0xbe   : > { %v711_v63 = vmin.f32 %v679_v59, 6.0  ;;  %v719_v0 = vmin.f32 %v687_v60, 6.0 }
  0xbf   : > { %758 = vst [vmem:[%s1169_s18 + $0x88] sm:$0xff] %v726_v61 }
  0xc0   : > { %766 = vst [vmem:[%s1169_s18 + $0xc8] sm:$0xff] %v734_v62  ;;  %v510_v1 = vpop.f32.mrf.mxu2  ;;  %v530_v2 = vpop.f32.mrf.mxu3 }
  0xc1   : > { %743 = vst [vmem:[%s1169_s18 + $0x10] sm:$0xff] %v711_v63  ;;  %v663_v3 = vadd.f32 %v1161_v24, %v510_v1  ;;  %v671_v4 = vadd.f32 %v1161_v24, %v530_v2  ;;  %v472_v5 = vpop.f32.mrf.mxu0  ;;  %v492_v6 = vpop.f32.mrf.mxu1 }
  0xc2   : > { %751 = vst [vmem:[%s1169_s18 + $0x50] sm:$0xff] %v719_v0  ;;  %v648_v7 = vadd.f32 %v1161_v24, %v472_v5  ;;  %v656_v8 = vadd.f32 %v1161_v24, %v492_v6 }
  0xc3   : > { %v695_v9 = vmax.f32 %v663_v3, 0.0  ;;  %v703_v10 = vmax.f32 %v671_v4, 0.0 }
  0xc4   : > { %v680_v11 = vmax.f32 %v648_v7, 0.0  ;;  %v688_v12 = vmax.f32 %v656_v8, 0.0 }
  0xc5   : > { %v727_v13 = vmin.f32 %v695_v9, 6.0  ;;  %v735_v14 = vmin.f32 %v703_v10, 6.0 }
  0xc6   : > { %v712_v15 = vmin.f32 %v680_v11, 6.0  ;;  %v720_v16 = vmin.f32 %v688_v12, 6.0 }
  0xc7   : > { %759 = vst [vmem:[%s1169_s18 + $0x90] sm:$0xff] %v727_v13 }
  0xc8   : > { %767 = vst [vmem:[%s1169_s18 + $0xd0] sm:$0xff] %v735_v14  ;;  %v512_v17 = vpop.f32.mrf.mxu2  ;;  %v532_v18 = vpop.f32.mrf.mxu3 }
  0xc9   : > { %744 = vst [vmem:[%s1169_s18 + $0x18] sm:$0xff] %v712_v15  ;;  %v664_v19 = vadd.f32 %v1161_v24, %v512_v17  ;;  %v672_v20 = vadd.f32 %v1161_v24, %v532_v18  ;;  %v475_v21 = vpop.f32.mrf.mxu0  ;;  %v495_v22 = vpop.f32.mrf.mxu1 }
  0xca   : > { %752 = vst [vmem:[%s1169_s18 + $0x58] sm:$0xff] %v720_v16  ;;  %v649_v23 = vadd.f32 %v1161_v24, %v475_v21  ;;  %v657_v25 = vadd.f32 %v1161_v24, %v495_v22 }
  0xcb   : > { %v696_v26 = vmax.f32 %v664_v19, 0.0  ;;  %v704_v27 = vmax.f32 %v672_v20, 0.0 }
  0xcc   : > { %v681_v28 = vmax.f32 %v649_v23, 0.0  ;;  %v689_v29 = vmax.f32 %v657_v25, 0.0 }
  0xcd   : > { %v728_v30 = vmin.f32 %v696_v26, 6.0  ;;  %v736_v31 = vmin.f32 %v704_v27, 6.0 }
  0xce   : > { %v713_v32 = vmin.f32 %v681_v28, 6.0  ;;  %v721_v33 = vmin.f32 %v689_v29, 6.0 }
  0xcf   : > { %760 = vst [vmem:[%s1169_s18 + $0x98] sm:$0xff] %v728_v30 }
  0xd0   : > { %768 = vst [vmem:[%s1169_s18 + $0xd8] sm:$0xff] %v736_v31  ;;  %v515_v34 = vpop.f32.mrf.mxu2  ;;  %v535_v35 = vpop.f32.mrf.mxu3 }
  0xd1   : > { %745 = vst [vmem:[%s1169_s18 + $0x20] sm:$0xff] %v713_v32  ;;  %v665_v36 = vadd.f32 %v1161_v24, %v515_v34  ;;  %v673_v37 = vadd.f32 %v1161_v24, %v535_v35  ;;  %v477_v38 = vpop.f32.mrf.mxu0  ;;  %v497_v39 = vpop.f32.mrf.mxu1 }
  0xd2   : > { %753 = vst [vmem:[%s1169_s18 + $0x60] sm:$0xff] %v721_v33  ;;  %v650_v40 = vadd.f32 %v1161_v24, %v477_v38  ;;  %v658_v41 = vadd.f32 %v1161_v24, %v497_v39 }
  0xd3   : > { %v697_v42 = vmax.f32 %v665_v36, 0.0  ;;  %v705_v43 = vmax.f32 %v673_v37, 0.0 }
  0xd4   : > { %v682_v44 = vmax.f32 %v650_v40, 0.0  ;;  %v690_v45 = vmax.f32 %v658_v41, 0.0 }
  0xd5   : > { %v729_v46 = vmin.f32 %v697_v42, 6.0  ;;  %v737_v47 = vmin.f32 %v705_v43, 6.0 }
  0xd6   : > { %v714_v48 = vmin.f32 %v682_v44, 6.0  ;;  %v722_v49 = vmin.f32 %v690_v45, 6.0 }
  0xd7   : > { %761 = vst [vmem:[%s1169_s18 + $0xa0] sm:$0xff] %v729_v46 }
  0xd8   : > { %769 = vst [vmem:[%s1169_s18 + $0xe0] sm:$0xff] %v737_v47  ;;  %v517_v50 = vpop.f32.mrf.mxu2  ;;  %v537_v51 = vpop.f32.mrf.mxu3 }
  0xd9   : > { %746 = vst [vmem:[%s1169_s18 + $0x28] sm:$0xff] %v714_v48  ;;  %v666_v52 = vadd.f32 %v1161_v24, %v517_v50  ;;  %v674_v53 = vadd.f32 %v1161_v24, %v537_v51  ;;  %v480_v54 = vpop.f32.mrf.mxu0  ;;  %v500_v55 = vpop.f32.mrf.mxu1 }
  0xda   : > { %754 = vst [vmem:[%s1169_s18 + $0x68] sm:$0xff] %v722_v49  ;;  %v651_v56 = vadd.f32 %v1161_v24, %v480_v54  ;;  %v659_v57 = vadd.f32 %v1161_v24, %v500_v55 }
  0xdb   : > { %v698_v58 = vmax.f32 %v666_v52, 0.0  ;;  %v706_v59 = vmax.f32 %v674_v53, 0.0 }
  0xdc   : > { %v683_v60 = vmax.f32 %v651_v56, 0.0  ;;  %v691_v61 = vmax.f32 %v659_v57, 0.0 }
  0xdd   : > { %v730_v62 = vmin.f32 %v698_v58, 6.0  ;;  %v738_v63 = vmin.f32 %v706_v59, 6.0 }
  0xde   : > { %v715_v0 = vmin.f32 %v683_v60, 6.0  ;;  %v723_v1 = vmin.f32 %v691_v61, 6.0 }
  0xdf   : > { %762 = vst [vmem:[%s1169_s18 + $0xa8] sm:$0xff] %v730_v62 }
  0xe0   : > { %770 = vst [vmem:[%s1169_s18 + $0xe8] sm:$0xff] %v738_v63  ;;  %v520_v2 = vpop.f32.mrf.mxu2  ;;  %v540_v3 = vpop.f32.mrf.mxu3 }
  0xe1   : > { %747 = vst [vmem:[%s1169_s18 + $0x30] sm:$0xff] %v715_v0  ;;  %v667_v4 = vadd.f32 %v1161_v24, %v520_v2  ;;  %v675_v5 = vadd.f32 %v1161_v24, %v540_v3  ;;  %v482_v6 = vpop.f32.mrf.mxu0  ;;  %v502_v7 = vpop.f32.mrf.mxu1 }
  0xe2   : > { %755 = vst [vmem:[%s1169_s18 + $0x70] sm:$0xff] %v723_v1  ;;  %v652_v8 = vadd.f32 %v1161_v24, %v482_v6  ;;  %v660_v9 = vadd.f32 %v1161_v24, %v502_v7 }
  0xe3   : > { %v699_v10 = vmax.f32 %v667_v4, 0.0  ;;  %v707_v11 = vmax.f32 %v675_v5, 0.0 }
  0xe4   : > { %v684_v12 = vmax.f32 %v652_v8, 0.0  ;;  %v692_v13 = vmax.f32 %v660_v9, 0.0 }
  0xe5   : > { %v731_v14 = vmin.f32 %v699_v10, 6.0  ;;  %v739_v15 = vmin.f32 %v707_v11, 6.0 }
  0xe6   : > { %v716_v16 = vmin.f32 %v684_v12, 6.0  ;;  %v724_v17 = vmin.f32 %v692_v13, 6.0 }
  0xe7   : > { %763 = vst [vmem:[%s1169_s18 + $0xb0] sm:$0xff] %v731_v14 }
  0xe8   : > { %771 = vst [vmem:[%s1169_s18 + $0xf0] sm:$0xff] %v739_v15  ;;  %v522_v18 = vpop.f32.mrf.mxu2  ;;  %v542_v19 = vpop.f32.mrf.mxu3 }
  0xe9   : > { %748 = vst [vmem:[%s1169_s18 + $0x38] sm:$0xff] %v716_v16  ;;  %v668_v20 = vadd.f32 %v1161_v24, %v522_v18  ;;  %v676_v21 = vadd.f32 %v1161_v24, %v542_v19 }
  0xea   : > { %756 = vst [vmem:[%s1169_s18 + $0x78] sm:$0xff] %v724_v17 }
  0xeb   : > { %v700_v22 = vmax.f32 %v668_v20, 0.0  ;;  %v708_v23 = vmax.f32 %v676_v21, 0.0 }
  0xed   : > { %v732_v25 = vmin.f32 %v700_v22, 6.0  ;;  %v740_v26 = vmin.f32 %v708_v23, 6.0 }
  0xef   : > { %764 = vst [vmem:[%s1169_s18 + $0xb8] sm:$0xff] %v732_v25 }
  0xf0   : > { %772 = vst [vmem:[%s1169_s18 + $0xf8] sm:$0xff] %v740_v26 }
  0xf1 PF: > { %s13_s14 = sadd.s32 1, %s1066_s14   ;;  %s1246_s12 = smov %s1062_s13 }
  0xf2   : > { %p10_p5 = scmp.ge.s32.totalorder %s13_s14, 4   ;;  %s1247_s13 = smov %s1249_s15 }
  0xf4   :  { %12 = sbr.rel (!%p10_p5) target bundleno = 2 (0x2), region = 63 }

</bundles_post_ra>
